<compile_context>
chip_gen: v7x
topology: tpu7x:2x2x1
jax: 0.10.0
libtpu: 0.0.40
codegen_flags: <defaults>
</compile_context>

<pallas_src>
import functools
import math

import jax
import jax.numpy as jnp
from jax.experimental import pallas as pl
from jax.experimental.pallas import tpu as pltpu

_LANES = 128
_TARGET_TILE_BYTES = 2 * 1024 * 1024   # ~2 MiB per row block: with double-buffered
                                       # in + out this stays well inside the default
                                       # scoped-VMEM limit on v5e/v6e/v7x.
_MAX_DENSE_FEAT = 1024                 # cap folded lane width so row blocks stay tall


def _film_kernel(x_ref, scale_ref, bias_ref, o_ref, *, use_sigmoid: bool):
    # Pure VPU/EUP elementwise op; f32 intermediates are free (mem-bound).
    x = x_ref[...].astype(jnp.float32)
    s = scale_ref[...].astype(jnp.float32)   # (1, feat) -> broadcast over rows
    b = bias_ref[...].astype(jnp.float32)
    y = x * s + b
    if use_sigmoid:
        y = jax.nn.sigmoid(y)
    o_ref[...] = y.astype(o_ref.dtype)


def _pick_row_tile(rows: int, feat: int, itemsize: int) -> int:
    """Largest row tile that is a sublane multiple and ~_TARGET_TILE_BYTES."""
    sub = {4: 8, 2: 16, 1: 32}.get(itemsize, 8)
    if rows <= sub:
        # block == full array extent along rows (always a legal block shape)
        return rows
    tr = max(sub, (_TARGET_TILE_BYTES // max(feat * itemsize, 1)) // sub * sub)
    # never make the block bigger than the sublane-rounded-down row count;
    # the tail (rows % tr) is a standard masked partial block.
    tr = min(tr, (rows // sub) * sub)
    return tr


def film(x, scale, bias=None, *, use_sigmoid: bool = False):
    """FiLM forward.  x: (..., dim), scale/bias: (dim,)."""
    orig_shape = x.shape
    dim = orig_shape[-1]

    # match torch: parameters are cast to x's dtype; missing bias -> zeros
    scale2 = scale.astype(x.dtype).reshape(1, dim)
    if bias is not None:
        bias2 = bias.astype(x.dtype).reshape(1, dim)
    else:
        bias2 = jnp.zeros((1, dim), dtype=x.dtype)

    x2 = x.reshape(-1, dim)
    rows = x2.shape[0]
    if rows == 0 or dim == 0:            # degenerate: nothing to compute
        return x

    # Lane-densify non-multiple-of-128 feature dims:
    #   (rows, dim) -> (rows/k, k*dim) with k*dim = lcm(dim, 128) (multiple of 128),
    # scale/bias tiled k times so broadcast semantics are preserved.
    feat = dim
    if dim % _LANES != 0:
        k = _LANES // math.gcd(dim, _LANES)
        if k > 1 and rows % k == 0 and k * dim <= _MAX_DENSE_FEAT:
            x2 = x2.reshape(rows // k, k * dim)
            scale2 = jnp.tile(scale2, (1, k))
            bias2 = jnp.tile(bias2, (1, k))
            rows, feat = x2.shape

    itemsize = jnp.dtype(x.dtype).itemsize
    tr = _pick_row_tile(rows, feat, itemsize)
    grid = (pl.cdiv(rows, tr),)

    kernel = functools.partial(_film_kernel, use_sigmoid=use_sigmoid)
    y2 = pl.pallas_call(
        kernel,
        out_shape=jax.ShapeDtypeStruct((rows, feat), x.dtype),
        grid=grid,
        in_specs=[
            pl.BlockSpec((tr, feat), lambda i: (i, 0)),   # row-tiled x
            pl.BlockSpec((1, feat), lambda i: (0, 0)),    # scale, VMEM-resident
            pl.BlockSpec((1, feat), lambda i: (0, 0)),    # bias,  VMEM-resident
        ],
        out_specs=pl.BlockSpec((tr, feat), lambda i: (i, 0)),
        compiler_params=pltpu.CompilerParams(
            dimension_semantics=("parallel",),            # megacore-shardable on v7x
        ),
    )(x2, scale2, bias2)

    return y2.reshape(orig_shape)


if __name__ == "__main__":
    key = jax.random.PRNGKey(0)
    k1, k2, k3 = jax.random.split(key, 3)

    def ref(x, scale, bias, use_sigmoid):
        y = scale.astype(x.dtype)[None, :] * x
        if bias is not None:
            y = y + bias.astype(x.dtype)[None, :]
        return jax.nn.sigmoid(y) if use_sigmoid else y

    # small shapes consistent with the module: batch=2, seq=8, hidden=32
    batch, seq, hidden = 2, 8, 32
    x = jax.random.normal(k1, (batch, seq, hidden), dtype=jnp.float32)
    scale = jax.random.normal(k2, (hidden,), dtype=jnp.float32)
    bias = jax.random.normal(k3, (hidden,), dtype=jnp.float32)

    # module defaults: bias=True, use_sigmoid=False
    y = jax.block_until_ready(film(x, scale, bias, use_sigmoid=False))
    assert jnp.allclose(y, ref(x, scale, bias, False), atol=1e-6), "mismatch (no sigmoid)"

    # use_sigmoid=True path
    y_sig = jax.block_until_ready(film(x, scale, bias, use_sigmoid=True))
    assert jnp.allclose(y_sig, ref(x, scale, bias, True), atol=1e-6), "mismatch (sigmoid)"

    # bias=False path
    y_nb = jax.block_until_ready(film(x, scale, None, use_sigmoid=False))
    assert jnp.allclose(y_nb, ref(x, scale, None, False), atol=1e-6), "mismatch (no bias)"

    # bias=False + sigmoid
    y_nbs = jax.block_until_ready(film(x, scale, None, use_sigmoid=True))
    assert jnp.allclose(y_nbs, ref(x, scale, None, True), atol=1e-6), "mismatch (no bias, sigmoid)"

    # rows not divisible by the densify factor -> fallback (dim<128) layout path
    x_odd = jax.random.normal(k1, (3, hidden), dtype=jnp.float32)
    y_odd = jax.block_until_ready(film(x_odd, scale, bias))
    assert jnp.allclose(y_odd, ref(x_odd, scale, bias, False), atol=1e-6), "mismatch (odd rows)"

    # dim not a divisor of 128 (exercises the lcm-based densify: dim=48 -> feat=384)
    dim48 = 48
    x48 = jax.random.normal(k1, (2, 8, dim48), dtype=jnp.float32)
    s48 = jax.random.normal(k2, (dim48,), dtype=jnp.float32)
    b48 = jax.random.normal(k3, (dim48,), dtype=jnp.float32)
    y48 = jax.block_until_ready(film(x48, s48, b48, use_sigmoid=True))
    assert jnp.allclose(y48, ref(x48, s48, b48, True), atol=1e-6), "mismatch (dim=48)"

    # bf16 inputs (f32 math in-kernel, cast back on store)
    xb = jax.random.normal(k1, (batch, seq, hidden), dtype=jnp.bfloat16)
    yb = jax.block_until_ready(film(xb, scale, bias, use_sigmoid=True))
    assert jnp.allclose(yb.astype(jnp.float32),
                        ref(xb, scale, bias, True).astype(jnp.float32),
                        atol=2e-2), "mismatch (bf16)"

    print("KERNEL_OK")
</pallas_src>

<mosaic_0001>
module attributes {stable_mosaic.version = 11 : i64} {
  func.func @_film_kernel(%arg0: i32, %arg1: memref<4x128xf32, #tpu.memory_space<vmem>>, %arg2: memref<1x128xf32, #tpu.memory_space<vmem>>, %arg3: memref<1x128xf32, #tpu.memory_space<vmem>>, %arg4: memref<4x128xf32, #tpu.memory_space<vmem>>) attributes {dimension_semantics = [#tpu.dimension_semantics<parallel>], iteration_bounds = array<i64: 1>, scalar_prefetch = 0 : i64, scratch_operands = 0 : i64, tpu.core_type = #tpu.core_type<tc>, window_params = [{transform_indices = @transform_0, window_bounds = array<i64: 4, 128>}, {pipeline_mode = #tpu.pipeline_mode<synchronous>, transform_indices = @transform_1, window_bounds = array<i64: 1, 128>}, {pipeline_mode = #tpu.pipeline_mode<synchronous>, transform_indices = @transform_2, window_bounds = array<i64: 1, 128>}, {transform_indices = @transform_3, window_bounds = array<i64: 4, 128>}]} {
    %c0 = arith.constant 0 : index
    %c0_0 = arith.constant 0 : index
    %0 = vector.load %arg1[%c0, %c0_0] : memref<4x128xf32, #tpu.memory_space<vmem>>, vector<4x128xf32>
    %c0_1 = arith.constant 0 : index
    %c0_2 = arith.constant 0 : index
    %1 = vector.load %arg2[%c0_1, %c0_2] : memref<1x128xf32, #tpu.memory_space<vmem>>, vector<1x128xf32>
    %c0_3 = arith.constant 0 : index
    %c0_4 = arith.constant 0 : index
    %2 = vector.load %arg3[%c0_3, %c0_4] : memref<1x128xf32, #tpu.memory_space<vmem>>, vector<1x128xf32>
    %3 = vector.broadcast %1 : vector<1x128xf32> to vector<4x128xf32>
    %4 = arith.mulf %0, %3 : vector<4x128xf32>
    %5 = vector.broadcast %2 : vector<1x128xf32> to vector<4x128xf32>
    %6 = arith.addf %4, %5 : vector<4x128xf32>
    %c0_5 = arith.constant 0 : index
    %c0_6 = arith.constant 0 : index
    %7 = vector.load %arg4[%c0_5, %c0_6] : memref<4x128xf32, #tpu.memory_space<vmem>>, vector<4x128xf32>
    tpu.vector_store %arg4[%c0_5, %c0_6], %6 {strides = array<i32>} : memref<4x128xf32, #tpu.memory_space<vmem>>, vector<4x128xf32>,
    return
  }
  func.func @transform_0(%arg0: i32) -> (i32, i32) {
    %c0_i32 = arith.constant 0 : i32
    %c0_i32_0 = arith.constant 0 : i32
    return %arg0, %c0_i32 : i32, i32
  }
  func.func @transform_1(%arg0: i32) -> (i32, i32) {
    %c0_i32 = arith.constant 0 : i32
    %c0_i32_0 = arith.constant 0 : i32
    %c0_i32_1 = arith.constant 0 : i32
    return %c0_i32, %c0_i32_0 : i32, i32
  }
  func.func @transform_2(%arg0: i32) -> (i32, i32) {
    %c0_i32 = arith.constant 0 : i32
    %c0_i32_0 = arith.constant 0 : i32
    %c0_i32_1 = arith.constant 0 : i32
    return %c0_i32, %c0_i32_0 : i32, i32
  }
  func.func @transform_3(%arg0: i32) -> (i32, i32) {
    %c0_i32 = arith.constant 0 : i32
    %c0_i32_0 = arith.constant 0 : i32
    return %arg0, %c0_i32 : i32, i32
  }
}

</mosaic_0001>

<bundles_post_ra>
// kernel: tpu_custom_call.1
= control target key start
LH: loop header
LB: loop body
LE: loop exit
PB: predicated region body
PF: predicated region fallthrough
CT: control target
= control target key end

     0   :  { %8 = vsyncpa [#allocation3], 0  ;;  %s164_s0 = inlined_call_operand.hbm [shape: f32[4,128], index: 0, kind: input, shape index: {}]   ;;  %s165_s1 = inlined_call_operand.vmem [shape: f32[1,128], index: 1, kind: input, shape index: {}]   ;;  %s166_s2 = inlined_call_operand.vmem [shape: f32[1,128], index: 2, kind: input, shape index: {}]   ;;  %s167_s3 = inlined_call_operand.hbm [shape: f32[4,128], index: 3, kind: output, shape index: {}]  }
   0x1   :  { %9 = vsyncpa [#allocation4], 0  ;;  %s112_s12 = smov [#allocation2]   ;;  %s64_s16 = scalar_lea.hbm %s164_s0, 64 }
   0x2   :  { %s16_s13 = sshll.u32 %s112_s12, 4  ;;  %p65_p0 = scmp.ne.s32.totalorder %s164_s0, %s64_s16  ;;  %s17_s13 = int_to_ptr.vmem [resolvable:$true] %s16_s13 }
   0x3   :  { %p68_p1 = scmp.lt.u32.totalorder %s64_s16, %s164_s0 }
   0x5   :  { %p70_p2 = pnand %p68_p1, %p65_p0 }
   0x7   :  { %73 = shalt.err (!%p70_p2)
}
   0x8   :  { %s74_s21 = scalar_lea.vmem %s17_s13, 64  ;;  %p79_p4 = scmp.lt.s32.totalorder %s17_s13, %s17_s13 }
   0x9   :  { %p75_p3 = scmp.ne.s32.totalorder %s17_s13, %s74_s21  ;;  %p80_p5 = scmp.lt.s32.totalorder %s74_s21, %s74_s21 }
   0xb   :  { %p81_p6 = por %p80_p5, %p79_p4 }
   0xd   :  { %p82_p7 = pnand %p81_p6, %p75_p3 }
   0xf   :  { %85 = shalt.err (!%p82_p7)
}
  0x10   :  { %19 = dma.hbm_to_vmem [thread:$0]  %s164_s0, 64, %s17_s13, [#allocation3]  }
  0x11   :  { %108 = dma.done.wait [#allocation3], 64  }
  0x12   :  { %109 = vsyncadd [#allocation3], 4294967232  ;;  %s113_s24 = smov [#allocation5]   ;;  %v27_v0 = vld [vmem:[#allocation2] sm:$0xf] }
  0x13   :  { %s51_s25 = sshll.u32 %s113_s24, 4  ;;  %v60_v1 = vld [vmem:[%s165_s1] ss:$0 sm:$0xff]  ;;  %s52_s25 = int_to_ptr.vmem [resolvable:$true] %s51_s25 }
  0x14   :  { %v61_v2 = vld [vmem:[%s166_s2] ss:$0 sm:$0xff]  ;;  %v36_v3 = vmul.f32 %v60_v1, %v27_v0  ;;  %s86_s30 = scalar_lea.vmem %s52_s25, 64  ;;  %p91_p9 = scmp.lt.s32.totalorder %s52_s25, %s52_s25 }
  0x15   :  { %p87_p8 = scmp.ne.s32.totalorder %s52_s25, %s86_s30  ;;  %p92_p10 = scmp.lt.s32.totalorder %s86_s30, %s86_s30 }
  0x16   :  { %v43_v4 = vadd.f32 %v61_v2, %v36_v3 }
  0x17   :  { %p93_p11 = por %p92_p10, %p91_p9 }
  0x18   :  { %44 = vst [vmem:[#allocation5] sm:$0xf] %v43_v4 }
  0x19   :  { %p94_p12 = pnand %p93_p11, %p87_p8 }
  0x1b   :  { %97 = shalt.err (!%p94_p12)
}
  0x1c   :  { %s98_s5 = scalar_lea.hbm %s167_s3, 64 }
  0x1d   :  { %p99_p13 = scmp.ne.s32.totalorder %s167_s3, %s98_s5  ;;  %p102_p0 = scmp.lt.u32.totalorder %s98_s5, %s167_s3 }
  0x1f   :  { %p104_p1 = pnand %p102_p0, %p99_p13 }
  0x21   :  { %107 = shalt.err (!%p104_p1)
}
  0x22   :  { %54 = dma.vmem_to_hbm [thread:$0]  %s52_s25, 64, %s167_s3, [#allocation4]  }
  0x23   :  { %110 = dma.done.wait [#allocation4], 64  }
  0x24   :  { %111 = vsyncadd [#allocation4], 4294967232 }
  0x25   :  { %58 = vsyncpa [#allocation3], 1 }
  0x26   :  { %59 = vsyncpa [#allocation4], 1 }

</bundles_post_ra>
